<compile_context>
chip_gen: v7x
topology: tpu7x:2x2x1
jax: 0.10.0
libtpu: 0.0.40
codegen_flags: <defaults>
</compile_context>

<pallas_src>
import jax
import jax.numpy as jnp
from jax.experimental import pallas as pl
from jax.experimental.pallas import tpu as pltpu

MARGIN_W1 = 1.0
MARGIN_W2 = 0.5


def _make_kernel(true_b: int, tile_rows: int, num_tiles: int):
    def kernel(a_ref, p_ref, n1_ref, n2_ref, out_ref,
               sum_ap_ref, sum_an_ref, dap_ref, dan1_ref, dn1n2_ref):
        i = pl.program_id(0)

        @pl.when(i == 0)
        def _init():
            sum_ap_ref[...] = jnp.zeros_like(sum_ap_ref)
            sum_an_ref[...] = jnp.zeros_like(sum_an_ref)

        # Row-validity mask for the (possibly partial / OOB-padded) tail tile.
        row_ids = i * tile_rows + jax.lax.broadcasted_iota(
            jnp.int32, (tile_rows, 1), 0)
        valid = row_ids < true_b

        def sqdist(x_ref, y_ref):
            # Subtract in the input dtype, upcast only the difference, and
            # accumulate the row-sum of squares in f32 (safe for bf16 inputs).
            d = (x_ref[...] - y_ref[...]).astype(jnp.float32)
            s = jnp.sum(d * d, axis=1, keepdims=True)      # (tile_rows, 1)
            return jnp.where(valid, s, 0.0)

        d_ap = sqdist(a_ref, p_ref)       # anchor - positive
        d_an1 = sqdist(a_ref, n1_ref)     # anchor - negative1
        d_an2 = sqdist(a_ref, n2_ref)     # anchor - negative2
        d_n1n2 = sqdist(n1_ref, n2_ref)   # negative1 - negative2

        # Batch-sum accumulators for the adaptive margins.
        sum_ap_ref[...] += jnp.sum(d_ap, keepdims=True)
        sum_an_ref[...] += jnp.sum(d_an1 + d_an2, keepdims=True)

        # Stash per-row distances needed by the relu terms, so the finalize
        # pass re-reads tiny VMEM instead of a second 4*B*D-byte HBM pass.
        dap_ref[i] = d_ap
        dan1_ref[i] = d_an1
        dn1n2_ref[i] = d_n1n2

        @pl.when(i == num_tiles - 1)
        def _finalize():
            inv_b = 1.0 / float(true_b)
            avg_aps = sum_ap_ref[0, 0] * inv_b
            avg_ans = sum_an_ref[0, 0] * (0.5 * inv_b)
            gap = avg_ans - avg_aps
            m1 = MARGIN_W1 * gap
            m2 = MARGIN_W2 * gap

            dap = dap_ref[...]            # (num_tiles, tile_rows, 1)
            dan1 = dan1_ref[...]
            dn1n2 = dn1n2_ref[...]

            loss = (jnp.maximum(m1 + dap - dan1, 0.0)
                    + jnp.maximum(m2 + dap - dn1n2, 0.0))
            total = jnp.sum(loss)
            # Padded rows have all stashed distances exactly 0, so each
            # contributes relu(m1) + relu(m2); remove that bias analytically.
            pad_rows = float(num_tiles * tile_rows - true_b)
            total = total - pad_rows * (jnp.maximum(m1, 0.0)
                                        + jnp.maximum(m2, 0.0))
            out_ref[0, 0] = total * inv_b

    return kernel


def _choose_tile_rows(batch: int, dim: int, itemsize: int) -> int:
    """Batch-tile size: big enough to approach the HBM roofline, small enough
    that 4 inputs x 2 pipeline buffers fit scoped VMEM on v5e/v6e/v7x."""
    per_input_budget = 2 * 1024 * 1024                 # ~2 MiB per input tile
    lane_dim = max(((dim + 127) // 128) * 128, 128)    # lane-padded footprint
    tb = per_input_budget // (lane_dim * itemsize)
    tb = max(8, min(int(tb), 1024))
    tb = (tb // 8) * 8                                 # sublane-aligned (f32)
    b_pad = ((batch + 7) // 8) * 8
    return min(tb, b_pad)


def adaptive_quadruplet_loss(anchor, positive, negative1, negative2,
                             *, tile_rows=None):
    """Pallas TPU implementation of AdaptiveQuadrupletLoss.forward ('euclidean')."""
    assert anchor.shape == positive.shape == negative1.shape == negative2.shape
    assert anchor.ndim == 2, "expected (B, D) embeddings"
    batch, dim = anchor.shape
    itemsize = jnp.dtype(anchor.dtype).itemsize

    if tile_rows is None:
        tile_rows = _choose_tile_rows(batch, dim, itemsize)
    num_tiles = pl.cdiv(batch, tile_rows)

    # VMEM budget: 4 inputs x 2 pipeline buffers + lane-padded distance stash.
    # Keep the requested limit within the smallest physical VMEM (64 MiB, v7x).
    lane_dim = max(((dim + 127) // 128) * 128, 128)
    in_bytes = 4 * 2 * tile_rows * lane_dim * itemsize
    stash_bytes = 3 * num_tiles * tile_rows * 128 * 4
    vmem_limit = int(min(max(2 * (in_bytes + stash_bytes), 32 * 1024 * 1024),
                         64 * 1024 * 1024))

    cost = pl.CostEstimate(
        flops=12 * batch * dim,
        transcendentals=0,
        bytes_accessed=4 * batch * dim * itemsize + 4,
    )

    kernel = _make_kernel(batch, tile_rows, num_tiles)
    in_spec = pl.BlockSpec((tile_rows, dim), lambda i: (i, 0))

    # TODO(synk): on v7x, split the batch over the 2 TensorCores (leading
    # "parallel" grid axis producing per-core partial sums) for ~2x bandwidth.
    out = pl.pallas_call(
        kernel,
        out_shape=jax.ShapeDtypeStruct((1, 1), jnp.float32),
        grid_spec=pltpu.PrefetchScalarGridSpec(
            num_scalar_prefetch=0,
            grid=(num_tiles,),
            in_specs=[in_spec, in_spec, in_spec, in_spec],
            out_specs=pl.BlockSpec(memory_space=pltpu.MemorySpace.SMEM),
            scratch_shapes=[
                pltpu.VMEM((1, 1), jnp.float32),                     # sum d_ap
                pltpu.VMEM((1, 1), jnp.float32),                     # sum d_an1+d_an2
                pltpu.VMEM((num_tiles, tile_rows, 1), jnp.float32),  # d_ap stash
                pltpu.VMEM((num_tiles, tile_rows, 1), jnp.float32),  # d_an1 stash
                pltpu.VMEM((num_tiles, tile_rows, 1), jnp.float32),  # d_n1n2 stash
            ],
        ),
        compiler_params=pltpu.CompilerParams(
            dimension_semantics=("arbitrary",),
            vmem_limit_bytes=vmem_limit,
        ),
        cost_estimate=cost,
    )(anchor, positive, negative1, negative2)
    return out[0, 0]


def _reference_loss(a, p, n1, n2):
    """Pure-JAX reference mirroring the PyTorch module."""
    a, p, n1, n2 = (x.astype(jnp.float32) for x in (a, p, n1, n2))
    d_pos = jnp.sum((a - p) ** 2, axis=1)
    d_neg = jnp.sum((a - n1) ** 2, axis=1)
    d_neg2 = jnp.sum((n1 - n2) ** 2, axis=1)
    dis_aps = jnp.sum((a - p) ** 2, axis=1)
    dis_an1 = jnp.sum((a - n1) ** 2, axis=1)
    dis_an2 = jnp.sum((a - n2) ** 2, axis=1)
    b = a.shape[0]
    avg_aps = jnp.sum(dis_aps) / b
    avg_ans = jnp.sum(dis_an1 + dis_an2) / (2 * b)
    m1 = MARGIN_W1 * (avg_ans - avg_aps)
    m2 = MARGIN_W2 * (avg_ans - avg_aps)
    loss = (jax.nn.relu(m1 + d_pos - d_neg)
            + jax.nn.relu(m2 + d_pos - d_neg2))
    return jnp.mean(loss)


def _run_case(key, batch, dim, tile_rows=None):
    ka, kp, k1, k2 = jax.random.split(key, 4)
    anchor = jax.random.normal(ka, (batch, dim), dtype=jnp.float32)
    positive = jax.random.normal(kp, (batch, dim), dtype=jnp.float32)
    negative1 = jax.random.normal(k1, (batch, dim), dtype=jnp.float32)
    negative2 = jax.random.normal(k2, (batch, dim), dtype=jnp.float32)

    loss = adaptive_quadruplet_loss(anchor, positive, negative1, negative2,
                                    tile_rows=tile_rows)
    loss = jax.block_until_ready(loss)
    ref = _reference_loss(anchor, positive, negative1, negative2)
    assert jnp.allclose(loss, ref, rtol=1e-4, atol=1e-4), (loss, ref)


if __name__ == "__main__":
    key = jax.random.PRNGKey(0)
    k_small, k_tiled = jax.random.split(key, 2)

    # Small single-tile case (matches the module's (B, D) embedding inputs).
    _run_case(k_small, batch=8, dim=32)

    # Multi-tile case with a partial tail tile (exercises accumulation,
    # masking against the true batch size, and the finalize pass).
    _run_case(k_tiled, batch=36, dim=160, tile_rows=16)

    print("KERNEL_OK")
</pallas_src>

<mosaic_0001>
module attributes {stable_mosaic.version = 11 : i64} {
  func.func @kernel(%arg0: i32, %arg1: memref<8x32xf32, #tpu.memory_space<vmem>>, %arg2: memref<8x32xf32, #tpu.memory_space<vmem>>, %arg3: memref<8x32xf32, #tpu.memory_space<vmem>>, %arg4: memref<8x32xf32, #tpu.memory_space<vmem>>, %arg5: memref<1x1xf32, #tpu.memory_space<smem>>, %arg6: memref<1x1xf32, #tpu.memory_space<vmem>>, %arg7: memref<1x1xf32, #tpu.memory_space<vmem>>, %arg8: memref<1x8x1xf32, #tpu.memory_space<vmem>>, %arg9: memref<1x8x1xf32, #tpu.memory_space<vmem>>, %arg10: memref<1x8x1xf32, #tpu.memory_space<vmem>>) attributes {dimension_semantics = [#tpu.dimension_semantics<arbitrary>], iteration_bounds = array<i64: 1>, scalar_prefetch = 0 : i64, scratch_operands = 5 : i64, tpu.core_type = #tpu.core_type<tc>, window_params = [{transform_indices = @transform_0, window_bounds = array<i64: 8, 32>}, {transform_indices = @transform_1, window_bounds = array<i64: 8, 32>}, {transform_indices = @transform_2, window_bounds = array<i64: 8, 32>}, {transform_indices = @transform_3, window_bounds = array<i64: 8, 32>}, {transform_indices = @transform_4, window_bounds = array<i64: 1, 1>}]} {
    %c0_i32 = arith.constant 0 : i32
    %0 = arith.cmpi eq, %arg0, %c0_i32 : i32
    %1 = arith.extui %0 : i1 to i32
    %c0_i32_0 = arith.constant 0 : i32
    %2 = arith.cmpi ne, %1, %c0_i32_0 : i32
    scf.if %2 {
      %cst_42 = arith.constant 0.000000e+00 : f32
      %73 = vector.broadcast %cst_42 : f32 to vector<1x1xf32>
      %c0_43 = arith.constant 0 : index
      %c0_44 = arith.constant 0 : index
      %74 = vector.load %arg6[%c0_43, %c0_44] : memref<1x1xf32, #tpu.memory_space<vmem>>, vector<1x1xf32>
      tpu.vector_store %arg6[%c0_43, %c0_44], %73 {strides = array<i32>} : memref<1x1xf32, #tpu.memory_space<vmem>>, vector<1x1xf32>,
      %cst_45 = arith.constant 0.000000e+00 : f32
      %75 = vector.broadcast %cst_45 : f32 to vector<1x1xf32>
      %c0_46 = arith.constant 0 : index
      %c0_47 = arith.constant 0 : index
      %76 = vector.load %arg7[%c0_46, %c0_47] : memref<1x1xf32, #tpu.memory_space<vmem>>, vector<1x1xf32>
      tpu.vector_store %arg7[%c0_46, %c0_47], %75 {strides = array<i32>} : memref<1x1xf32, #tpu.memory_space<vmem>>, vector<1x1xf32>,
    } else {
    }
    %c8_i32 = arith.constant 8 : i32
    %3 = arith.muli %arg0, %c8_i32 : i32
    %4 = tpu.iota {dimensions = array<i32: 0>} : vector<8x1xi32>
    %5 = vector.broadcast %3 : i32 to vector<8x1xi32>
    %6 = arith.addi %5, %4 : vector<8x1xi32>
    %c8_i32_1 = arith.constant 8 : i32
    %7 = vector.broadcast %c8_i32_1 : i32 to vector<8x1xi32>
    %8 = arith.cmpi slt, %6, %7 : vector<8x1xi32>
    %c0 = arith.constant 0 : index
    %c0_2 = arith.constant 0 : index
    %9 = vector.load %arg1[%c0, %c0_2] : memref<8x32xf32, #tpu.memory_space<vmem>>, vector<8x32xf32>
    %c0_3 = arith.constant 0 : index
    %c0_4 = arith.constant 0 : index
    %10 = vector.load %arg2[%c0_3, %c0_4] : memref<8x32xf32, #tpu.memory_space<vmem>>, vector<8x32xf32>
    %11 = arith.subf %9, %10 : vector<8x32xf32>
    %12 = arith.mulf %11, %11 : vector<8x32xf32>
    %cst = arith.constant dense<0.000000e+00> : vector<8xf32>
    %13 = vector.multi_reduction <add>, %12, %cst [1] : vector<8x32xf32> to vector<8xf32>
    %14 = vector.shape_cast %13 : vector<8xf32> to vector<8x1xf32>
    %cst_5 = arith.constant 0.000000e+00 : f32
    %15 = vector.broadcast %cst_5 : f32 to vector<8x1xf32>
    %16 = arith.select %8, %14, %15 : vector<8x1xi1>, vector<8x1xf32>
    %c0_6 = arith.constant 0 : index
    %c0_7 = arith.constant 0 : index
    %17 = vector.load %arg1[%c0_6, %c0_7] : memref<8x32xf32, #tpu.memory_space<vmem>>, vector<8x32xf32>
    %c0_8 = arith.constant 0 : index
    %c0_9 = arith.constant 0 : index
    %18 = vector.load %arg3[%c0_8, %c0_9] : memref<8x32xf32, #tpu.memory_space<vmem>>, vector<8x32xf32>
    %19 = arith.subf %17, %18 : vector<8x32xf32>
    %20 = arith.mulf %19, %19 : vector<8x32xf32>
    %cst_10 = arith.constant dense<0.000000e+00> : vector<8xf32>
    %21 = vector.multi_reduction <add>, %20, %cst_10 [1] : vector<8x32xf32> to vector<8xf32>
    %22 = vector.shape_cast %21 : vector<8xf32> to vector<8x1xf32>
    %cst_11 = arith.constant 0.000000e+00 : f32
    %23 = vector.broadcast %cst_11 : f32 to vector<8x1xf32>
    %24 = arith.select %8, %22, %23 : vector<8x1xi1>, vector<8x1xf32>
    %c0_12 = arith.constant 0 : index
    %c0_13 = arith.constant 0 : index
    %25 = vector.load %arg1[%c0_12, %c0_13] : memref<8x32xf32, #tpu.memory_space<vmem>>, vector<8x32xf32>
    %c0_14 = arith.constant 0 : index
    %c0_15 = arith.constant 0 : index
    %26 = vector.load %arg4[%c0_14, %c0_15] : memref<8x32xf32, #tpu.memory_space<vmem>>, vector<8x32xf32>
    %27 = arith.subf %25, %26 : vector<8x32xf32>
    %28 = arith.mulf %27, %27 : vector<8x32xf32>
    %cst_16 = arith.constant dense<0.000000e+00> : vector<8xf32>
    %29 = vector.multi_reduction <add>, %28, %cst_16 [1] : vector<8x32xf32> to vector<8xf32>
    %30 = vector.shape_cast %29 : vector<8xf32> to vector<8x1xf32>
    %cst_17 = arith.constant 0.000000e+00 : f32
    %31 = vector.broadcast %cst_17 : f32 to vector<8x1xf32>
    %32 = arith.select %8, %30, %31 : vector<8x1xi1>, vector<8x1xf32>
    %c0_18 = arith.constant 0 : index
    %c0_19 = arith.constant 0 : index
    %33 = vector.load %arg3[%c0_18, %c0_19] : memref<8x32xf32, #tpu.memory_space<vmem>>, vector<8x32xf32>
    %c0_20 = arith.constant 0 : index
    %c0_21 = arith.constant 0 : index
    %34 = vector.load %arg4[%c0_20, %c0_21] : memref<8x32xf32, #tpu.memory_space<vmem>>, vector<8x32xf32>
    %35 = arith.subf %33, %34 : vector<8x32xf32>
    %36 = arith.mulf %35, %35 : vector<8x32xf32>
    %cst_22 = arith.constant dense<0.000000e+00> : vector<8xf32>
    %37 = vector.multi_reduction <add>, %36, %cst_22 [1] : vector<8x32xf32> to vector<8xf32>
    %38 = vector.shape_cast %37 : vector<8xf32> to vector<8x1xf32>
    %cst_23 = arith.constant 0.000000e+00 : f32
    %39 = vector.broadcast %cst_23 : f32 to vector<8x1xf32>
    %40 = arith.select %8, %38, %39 : vector<8x1xi1>, vector<8x1xf32>
    %c0_24 = arith.constant 0 : index
    %c0_25 = arith.constant 0 : index
    %41 = vector.load %arg6[%c0_24, %c0_25] : memref<1x1xf32, #tpu.memory_space<vmem>>, vector<1x1xf32>
    %42 = vector.shape_cast %16 : vector<8x1xf32> to vector<1x8x1xf32>
    %cst_26 = arith.constant dense<0.000000e+00> : vector<1xf32>
    %43 = vector.multi_reduction <add>, %42, %cst_26 [1, 2] : vector<1x8x1xf32> to vector<1xf32>
    %44 = vector.shape_cast %43 : vector<1xf32> to vector<1x1x1xf32>
    %45 = vector.extract %44[0, 0, 0] : f32 from vector<1x1x1xf32>
    %46 = vector.broadcast %45 : f32 to vector<1x1xf32>
    %47 = arith.addf %41, %46 : vector<1x1xf32>
    %c0_27 = arith.constant 0 : index
    %c0_28 = arith.constant 0 : index
    %48 = vector.load %arg6[%c0_27, %c0_28] : memref<1x1xf32, #tpu.memory_space<vmem>>, vector<1x1xf32>
    tpu.vector_store %arg6[%c0_27, %c0_28], %47 {strides = array<i32>} : memref<1x1xf32, #tpu.memory_space<vmem>>, vector<1x1xf32>,
    %c0_29 = arith.constant 0 : index
    %c0_30 = arith.constant 0 : index
    %49 = vector.load %arg7[%c0_29, %c0_30] : memref<1x1xf32, #tpu.memory_space<vmem>>, vector<1x1xf32>
    %50 = arith.addf %24, %32 : vector<8x1xf32>
    %51 = vector.shape_cast %50 : vector<8x1xf32> to vector<1x8x1xf32>
    %cst_31 = arith.constant dense<0.000000e+00> : vector<1xf32>
    %52 = vector.multi_reduction <add>, %51, %cst_31 [1, 2] : vector<1x8x1xf32> to vector<1xf32>
    %53 = vector.shape_cast %52 : vector<1xf32> to vector<1x1x1xf32>
    %54 = vector.extract %53[0, 0, 0] : f32 from vector<1x1x1xf32>
    %55 = vector.broadcast %54 : f32 to vector<1x1xf32>
    %56 = arith.addf %49, %55 : vector<1x1xf32>
    %c0_32 = arith.constant 0 : index
    %c0_33 = arith.constant 0 : index
    %57 = vector.load %arg7[%c0_32, %c0_33] : memref<1x1xf32, #tpu.memory_space<vmem>>, vector<1x1xf32>
    tpu.vector_store %arg7[%c0_32, %c0_33], %56 {strides = array<i32>} : memref<1x1xf32, #tpu.memory_space<vmem>>, vector<1x1xf32>,
    %58 = arith.index_cast %arg0 : i32 to index
    %c0_34 = arith.constant 0 : index
    %c0_35 = arith.constant 0 : index
    %59 = vector.load %arg8[%58, %c0_34, %c0_35] : memref<1x8x1xf32, #tpu.memory_space<vmem>>, vector<1x8x1xf32>
    %60 = vector.shape_cast %59 : vector<1x8x1xf32> to vector<8x1xf32>
    %61 = vector.shape_cast %16 : vector<8x1xf32> to vector<1x8x1xf32>
    tpu.vector_store %arg8[%58, %c0_34, %c0_35], %61 {strides = array<i32>} : memref<1x8x1xf32, #tpu.memory_space<vmem>>, vector<1x8x1xf32>,
    %62 = arith.index_cast %arg0 : i32 to index
    %c0_36 = arith.constant 0 : index
    %c0_37 = arith.constant 0 : index
    %63 = vector.load %arg9[%62, %c0_36, %c0_37] : memref<1x8x1xf32, #tpu.memory_space<vmem>>, vector<1x8x1xf32>
    %64 = vector.shape_cast %63 : vector<1x8x1xf32> to vector<8x1xf32>
    %65 = vector.shape_cast %24 : vector<8x1xf32> to vector<1x8x1xf32>
    tpu.vector_store %arg9[%62, %c0_36, %c0_37], %65 {strides = array<i32>} : memref<1x8x1xf32, #tpu.memory_space<vmem>>, vector<1x8x1xf32>,
    %66 = arith.index_cast %arg0 : i32 to index
    %c0_38 = arith.constant 0 : index
    %c0_39 = arith.constant 0 : index
    %67 = vector.load %arg10[%66, %c0_38, %c0_39] : memref<1x8x1xf32, #tpu.memory_space<vmem>>, vector<1x8x1xf32>
    %68 = vector.shape_cast %67 : vector<1x8x1xf32> to vector<8x1xf32>
    %69 = vector.shape_cast %40 : vector<8x1xf32> to vector<1x8x1xf32>
    tpu.vector_store %arg10[%66, %c0_38, %c0_39], %69 {strides = array<i32>} : memref<1x8x1xf32, #tpu.memory_space<vmem>>, vector<1x8x1xf32>,
    %c0_i32_40 = arith.constant 0 : i32
    %70 = arith.cmpi eq, %arg0, %c0_i32_40 : i32
    %71 = arith.extui %70 : i1 to i32
    %c0_i32_41 = arith.constant 0 : i32
    %72 = arith.cmpi ne, %71, %c0_i32_41 : i32
    scf.if %72 {
      %c0_42 = arith.constant 0 : index
      %c0_43 = arith.constant 0 : index
      %73 = vector.load %arg6[%c0_42, %c0_43] : memref<1x1xf32, #tpu.memory_space<vmem>>, vector<1x1xf32>
      %74 = vector.extract %73[0, 0] : f32 from vector<1x1xf32>
      %cst_44 = arith.constant 1.250000e-01 : f32
      %75 = arith.mulf %74, %cst_44 : f32
      %c0_45 = arith.constant 0 : index
      %c0_46 = arith.constant 0 : index
      %76 = vector.load %arg7[%c0_45, %c0_46] : memref<1x1xf32, #tpu.memory_space<vmem>>, vector<1x1xf32>
      %77 = vector.extract %76[0, 0] : f32 from vector<1x1xf32>
      %cst_47 = arith.constant 6.250000e-02 : f32
      %78 = arith.mulf %77, %cst_47 : f32
      %79 = arith.subf %78, %75 : f32
      %cst_48 = arith.constant 1.000000e+00 : f32
      %80 = arith.mulf %cst_48, %79 : f32
      %cst_49 = arith.constant 5.000000e-01 : f32
      %81 = arith.mulf %cst_49, %79 : f32
      %c0_50 = arith.constant 0 : index
      %c0_51 = arith.constant 0 : index
      %c0_52 = arith.constant 0 : index
      %82 = vector.load %arg8[%c0_50, %c0_51, %c0_52] : memref<1x8x1xf32, #tpu.memory_space<vmem>>, vector<1x8x1xf32>
      %c0_53 = arith.constant 0 : index
      %c0_54 = arith.constant 0 : index
      %c0_55 = arith.constant 0 : index
      %83 = vector.load %arg9[%c0_53, %c0_54, %c0_55] : memref<1x8x1xf32, #tpu.memory_space<vmem>>, vector<1x8x1xf32>
      %c0_56 = arith.constant 0 : index
      %c0_57 = arith.constant 0 : index
      %c0_58 = arith.constant 0 : index
      %84 = vector.load %arg10[%c0_56, %c0_57, %c0_58] : memref<1x8x1xf32, #tpu.memory_space<vmem>>, vector<1x8x1xf32>
      %85 = vector.broadcast %80 : f32 to vector<1x8x1xf32>
      %86 = arith.addf %85, %82 : vector<1x8x1xf32>
      %87 = arith.subf %86, %83 : vector<1x8x1xf32>
      %cst_59 = arith.constant 0.000000e+00 : f32
      %88 = vector.broadcast %cst_59 : f32 to vector<1x8x1xf32>
      %89 = arith.maximumf %87, %88 : vector<1x8x1xf32>
      %90 = vector.broadcast %81 : f32 to vector<1x8x1xf32>
      %91 = arith.addf %90, %82 : vector<1x8x1xf32>
      %92 = arith.subf %91, %84 : vector<1x8x1xf32>
      %cst_60 = arith.constant 0.000000e+00 : f32
      %93 = vector.broadcast %cst_60 : f32 to vector<1x8x1xf32>
      %94 = arith.maximumf %92, %93 : vector<1x8x1xf32>
      %95 = arith.addf %89, %94 : vector<1x8x1xf32>
      %96 = vector.shape_cast %95 : vector<1x8x1xf32> to vector<1x1x8x1xf32>
      %cst_61 = arith.constant dense<0.000000e+00> : vector<1xf32>
      %97 = vector.multi_reduction <add>, %96, %cst_61 [1, 2, 3] : vector<1x1x8x1xf32> to vector<1xf32>
      %98 = vector.shape_cast %97 : vector<1xf32> to vector<1x1x1x1xf32>
      %99 = vector.extract %98[0, 0, 0, 0] : f32 from vector<1x1x1x1xf32>
      %cst_62 = arith.constant 0.000000e+00 : f32
      %100 = arith.maximumf %80, %cst_62 : f32
      %cst_63 = arith.constant 0.000000e+00 : f32
      %101 = arith.maximumf %81, %cst_63 : f32
      %102 = arith.addf %100, %101 : f32
      %cst_64 = arith.constant 0.000000e+00 : f32
      %103 = arith.mulf %cst_64, %102 : f32
      %104 = arith.subf %99, %103 : f32
      %cst_65 = arith.constant 1.250000e-01 : f32
      %105 = arith.mulf %104, %cst_65 : f32
      %c0_66 = arith.constant 0 : index
      %c0_67 = arith.constant 0 : index
      %106 = memref.load %arg5[%c0_66, %c0_67] : memref<1x1xf32, #tpu.memory_space<smem>>
      memref.store %105, %arg5[%c0_66, %c0_67] : memref<1x1xf32, #tpu.memory_space<smem>>
    } else {
    }
    return
  }
  func.func @transform_0(%arg0: i32) -> (i32, i32) {
    %c0_i32 = arith.constant 0 : i32
    %c0_i32_0 = arith.constant 0 : i32
    return %arg0, %c0_i32 : i32, i32
  }
  func.func @transform_1(%arg0: i32) -> (i32, i32) {
    %c0_i32 = arith.constant 0 : i32
    %c0_i32_0 = arith.constant 0 : i32
    return %arg0, %c0_i32 : i32, i32
  }
  func.func @transform_2(%arg0: i32) -> (i32, i32) {
    %c0_i32 = arith.constant 0 : i32
    %c0_i32_0 = arith.constant 0 : i32
    return %arg0, %c0_i32 : i32, i32
  }
  func.func @transform_3(%arg0: i32) -> (i32, i32) {
    %c0_i32 = arith.constant 0 : i32
    %c0_i32_0 = arith.constant 0 : i32
    return %arg0, %c0_i32 : i32, i32
  }
  func.func @transform_4(%arg0: i32) -> (i32, i32) {
    %c0_i32 = arith.constant 0 : i32
    %c0_i32_0 = arith.constant 0 : i32
    %c0_i32_1 = arith.constant 0 : i32
    return %c0_i32, %c0_i32_0 : i32, i32
  }
}

</mosaic_0001>

<bundles_post_ra>
// kernel: tpu_custom_call.1
= control target key start
LH: loop header
LB: loop body
LE: loop exit
PB: predicated region body
PF: predicated region fallthrough
CT: control target
= control target key end

     0   :  { %9 = vsyncpa [#allocation8], 0  ;;  %s378_s0 = inlined_call_operand.hbm [shape: f32[8,32], index: 0, kind: input, shape index: {}]   ;;  %s379_s1 = inlined_call_operand.hbm [shape: f32[8,32], index: 1, kind: input, shape index: {}]   ;;  %s380_s2 = inlined_call_operand.hbm [shape: f32[8,32], index: 2, kind: input, shape index: {}]   ;;  %s381_s3 = inlined_call_operand.vmem [shape: f32[8,32], index: 3, kind: input, shape index: {}]   ;;  %s382_s4 = inlined_call_operand.hbm [shape: f32[1,1], index: 4, kind: output, shape index: {}]  }
   0x1   :  { %10 = vsyncpa [#allocation11], 0 }
   0x2   :  { %11 = vsyncpa [#allocation9], 0  ;;  %s286_s15 = smov [#allocation10]   ;;  %s287_s17 = smov [#allocation7]  }
   0x3   :  { %s28_s16 = sshll.u32 %s286_s15, 4  ;;  %s18_s18 = sshll.u32 %s287_s17, 4  ;;  %s29_s16 = int_to_ptr.vmem [resolvable:$true] %s28_s16  ;;  %s19_s18 = int_to_ptr.vmem [resolvable:$true] %s18_s18 }
   0x4   :  { %s204_s21 = scalar_lea.hbm %s379_s1, 128 }
   0x5   :  { %p205_p0 = scmp.ne.s32.totalorder %s379_s1, %s204_s21  ;;  %p208_p1 = scmp.lt.u32.totalorder %s204_s21, %s379_s1 }
   0x7   :  { %p210_p2 = pnand %p208_p1, %p205_p0 }
   0x9   :  { %213 = shalt.err (!%p210_p2)
}
   0xa   :  { %s214_s26 = scalar_lea.vmem %s29_s16, 128  ;;  %p219_p4 = scmp.lt.s32.totalorder %s29_s16, %s29_s16 }
   0xb   :  { %p215_p3 = scmp.ne.s32.totalorder %s29_s16, %s214_s26  ;;  %p220_p5 = scmp.lt.s32.totalorder %s214_s26, %s214_s26 }
   0xd   :  { %p221_p6 = por %p220_p5, %p219_p4 }
   0xf   :  { %p222_p7 = pnand %p221_p6, %p215_p3 }
  0x11   :  { %225 = shalt.err (!%p222_p7)
}
  0x12   :  { %31 = dma.hbm_to_vmem [thread:$0]  %s379_s1, 128, %s29_s16, [#allocation11]  }
  0x13   :  { %s226_s5 = scalar_lea.hbm %s378_s0, 128 }
  0x14   :  { %p227_p8 = scmp.ne.s32.totalorder %s378_s0, %s226_s5  ;;  %p230_p9 = scmp.lt.u32.totalorder %s226_s5, %s378_s0 }
  0x16   :  { %p232_p10 = pnand %p230_p9, %p227_p8 }
  0x18   :  { %235 = shalt.err (!%p232_p10)
}
  0x19   :  { %s236_s10 = scalar_lea.vmem %s19_s18, 128  ;;  %p241_p12 = scmp.lt.s32.totalorder %s19_s18, %s19_s18 }
  0x1a   :  { %p237_p11 = scmp.ne.s32.totalorder %s19_s18, %s236_s10  ;;  %p242_p13 = scmp.lt.s32.totalorder %s236_s10, %s236_s10 }
  0x1c   :  { %p243_p0 = por %p242_p13, %p241_p12 }
  0x1e   :  { %p244_p1 = pnand %p243_p0, %p237_p11 }
  0x20   :  { %247 = shalt.err (!%p244_p1)
}
  0x21   :  { %21 = dma.hbm_to_vmem [thread:$0]  %s378_s0, 128, %s19_s18, [#allocation8]  }
  0x22   :  { %s288_s12 = smov [#allocation12]   ;;  %s248_s16 = scalar_lea.hbm %s380_s2, 128 }
  0x23   :  { %s38_s13 = sshll.u32 %s288_s12, 4  ;;  %p249_p2 = scmp.ne.s32.totalorder %s380_s2, %s248_s16  ;;  %s39_s13 = int_to_ptr.vmem [resolvable:$true] %s38_s13 }
  0x24   :  { %p252_p3 = scmp.lt.u32.totalorder %s248_s16, %s380_s2 }
  0x26   :  { %p254_p4 = pnand %p252_p3, %p249_p2 }
  0x28   :  { %257 = shalt.err (!%p254_p4)
}
  0x29   :  { %s258_s22 = scalar_lea.vmem %s39_s13, 128  ;;  %p263_p6 = scmp.lt.s32.totalorder %s39_s13, %s39_s13 }
  0x2a   :  { %p259_p5 = scmp.ne.s32.totalorder %s39_s13, %s258_s22  ;;  %p264_p7 = scmp.lt.s32.totalorder %s258_s22, %s258_s22 }
  0x2c   :  { %p265_p8 = por %p264_p7, %p263_p6 }
  0x2e   :  { %p266_p9 = pnand %p265_p8, %p259_p5 }
  0x30   :  { %269 = shalt.err (!%p266_p9)
}
  0x31   :  { %41 = dma.hbm_to_vmem [thread:$0]  %s380_s2, 128, %s39_s13, [#allocation11]  }
  0x32   :  { %280 = dma.done.wait [#allocation8], 128  }
  0x33   :  { %281 = vsyncadd [#allocation8], 4294967168 }
  0x34   :  { %282 = dma.done.wait [#allocation11], 256  }
  0x35   :  { %283 = vsyncadd [#allocation11], 4294967040  ;;  %v66_v0 = vld [vmem:[#allocation7] sm:$0xff]  ;;  %v75_v1 = vld [vmem:[#allocation12] sm:$0xff]  ;;  %vm70_vm0 = vcmask 261120   ;;  %vm96_vm1 = vcmask 7168  }
  0x36   :  { %v67_v2 = vld [vmem:[#allocation10] sm:$0xff]  ;;  %v76_v3 = vsub.f32 %v66_v0, %v75_v1  ;;  %vm57_vm2 = vcmask 0   ;;  %v289_v22 = vmov 0.0   ;;  %s290_s5 = smov 0.0   ;;  %s270_s14 = scalar_lea.hbm %s382_s4, 16 }
  0x37   :  { %v68_v4 = vsub.f32 %v66_v0, %v67_v2  ;;  %v82_v5 = vld [vmem:[%s381_s3] sm:$0xff]  ;;  %58 = vst.msk [vmem:[#allocation2] sm:$0x1] %vm57_vm2, %v289_v22  ;;  %59 = vst.msk [vmem:[#allocation3] sm:$0x1] %vm57_vm2, %v289_v22  ;;  %p271_p10 = scmp.ne.s32.totalorder %s382_s4, %s270_s14  ;;  %p274_p11 = scmp.lt.u32.totalorder %s270_s14, %s382_s4 }
  0x38   :  { %v83_v6 = vsub.f32 %v66_v0, %v82_v5  ;;  %v77_v7 = vmul.f32 %v76_v3, %v76_v3  ;;  %v89_v13 = vsub.f32 %v75_v1, %v82_v5 }
  0x39   :  { %v69_v8 = vmul.f32 %v68_v4, %v68_v4  ;;  %p276_p12 = pnand %p274_p11, %p271_p10 }
  0x3a   :  { %v84_v9 = vmul.f32 %v83_v6, %v83_v6  ;;  %v78_v10 = vsel %vm70_vm0, %v77_v7, 0.0  ;;  %v90_v14 = vmul.f32 %v89_v13, %v89_v13 }
  0x3b   :  { %v71_v11 = vsel %vm70_vm0, %v69_v8, 0.0  ;;  %79 = vadd.xlane.f32.xlu0 %v78_v10 }
  0x3c   :  { %72 = vadd.xlane.f32.xlu1 %v71_v11  ;;  %v85_v12 = vsel %vm70_vm0, %v84_v9, 0.0  ;;  %v91_v15 = vsel %vm70_vm0, %v90_v14, 0.0 }
  0x3e   :  { %v95_v38 = vld [vmem:[#allocation2] sm:$0x1]  ;;  %v111_v41 = vld [vmem:[#allocation3] sm:$0x1] }
  0x3f   :  { %86 = vadd.xlane.f32.xlu0 %v85_v12 }
  0xc8   :  { %v80_v16 = vpop.xlane.xlu0 %79 }
  0xc9   :  { %v73_v17 = vpop.xlane.xlu1 %72  ;;  %129 = vst.msk [vmem:[#allocation5] sm:$0xff] %vm96_vm1, %v80_v16 }
  0xca   :  { %127 = vst.msk [vmem:[#allocation4] sm:$0xff] %vm96_vm1, %v73_v17  ;;  %v97_v18 = vsel %vm96_vm1, %v73_v17, 0.0 }
  0xcb   :  { %98 = vadd.xlane.f32.xlu1 %v97_v18 }
  0xcc   :  { %v87_v19 = vpop.xlane.xlu0 %86 }
  0xcd   :  { %v112_v20 = vadd.f32 %v87_v19, %v80_v16 }
  0xcf   :  { %92 = vadd.xlane.f32.xlu1 %v91_v15  ;;  %v113_v21 = vsel %vm96_vm1, %v112_v20, 0.0 }
  0xd0   :  { %114 = vadd.xlane.f32.xlu0 %v113_v21  ;;  %v144_v49 = vld [vmem:[#allocation5] sm:$0xff] }
  0xd1   :  { %v143_v47 = vld [vmem:[#allocation4] sm:$0xff] }
 0x158   :  { %v99_v23 = vpop.xlane.xlu1 %98 }
 0x159   :  { %v100_v24 = vrot.slane %v99_v23, 4 }
 0x15b   :  { %v101_v25 = vadd.f32 %v100_v24, %v99_v23 }
 0x15c   :  { %v93_v26 = vpop.xlane.xlu1 %92 }
 0x15d   :  { %v102_v27 = vrot.slane %v101_v25, 2  ;;  %131 = vst.msk [vmem:[#allocation6] sm:$0xff] %vm96_vm1, %v93_v26  ;;  %v115_v28 = vpop.xlane.xlu0 %114 }
 0x15e   :  { %v116_v29 = vrot.slane %v115_v28, 4 }
 0x15f   :  { %v103_v30 = vadd.f32 %v102_v27, %v101_v25 }
 0x160   :  { %v117_v31 = vadd.f32 %v116_v29, %v115_v28 }
 0x161   :  { %v104_v32 = vrot.slane %v103_v30, 1 }
 0x162   :  { %v118_v33 = vrot.slane %v117_v31, 2 }
 0x163   :  { %v105_v34 = vadd.f32 %v104_v32, %v103_v30 }
 0x164   :  { %v119_v35 = vadd.f32 %v118_v33, %v117_v31  ;;  %v145_v50 = vld [vmem:[#allocation6] sm:$0xff] }
 0x165   :  { %188 = vpush %v105_v34 }
 0x166   :  { %v120_v36 = vrot.slane %v119_v35, 1 }
 0x168   :  { %v121_v37 = vadd.f32 %v120_v36, %v119_v35 }
 0x16a   :  { %190 = vpush %v121_v37 }
 0x196   :  { %s189_s2 = spop %188 }
 0x197   :  { %v107_v39 = vstv %s189_s2 }
 0x198   :  { %v108_v40 = vadd.f32 %v107_v39, %v95_v38 }
 0x19a   :  { %110 = vst.msk [vmem:[#allocation2] sm:$0x1] %vm57_vm2, %v108_v40 }
 0x19b   :  { %s191_s3 = spop %190 }
 0x19c   :  { %v123_v42 = vstv %s191_s3 }
 0x19d   :  { %v124_v43 = vadd.f32 %v123_v42, %v111_v41 }
 0x19f   :  { %125 = vst.msk [vmem:[#allocation3] sm:$0x1] %vm57_vm2, %v124_v43 }
 0x1a1   :  { %v135_v44 = vld [vmem:[#allocation2] sm:$0x1] }
 0x1a2   :  { %192 = vpush %v135_v44 }
 0x1a6   :  { %v138_v45 = vld [vmem:[#allocation3] sm:$0x1] }
 0x1a7   :  { %194 = vpush %v138_v45 }
 0x1d3   :  { %s193_s25 = spop %192 }
 0x1d4   :  { %s137_s26 = smul.f32 0.125, %s193_s25 }
 0x1d8   :  { %s195_s27 = spop %194 }
 0x1d9   :  { %s140_s28 = smul.f32 0.0625, %s195_s27 }
 0x1db   :  { %s141_s29 = ssub.f32 %s140_s28, %s137_s26 }
 0x1dd   :  { %s142_s30 = smul.f32 0.5, %s141_s29  ;;  %v146_v46 = vstv %s141_s29  ;;  %s165_s6 = smax.f32 %s290_s5, %s141_s29 }
 0x1de   :  { %v147_v48 = vadd.f32 %v146_v46, %v143_v47 }
 0x1df   :  { %v150_v51 = vstv %s142_s30  ;;  %s166_s7 = smax.f32 %s290_s5, %s142_s30 }
 0x1e0   :  { %v148_v52 = vsub.f32 %v147_v48, %v144_v49  ;;  %v151_v53 = vadd.f32 %v150_v51, %v143_v47  ;;  %s167_s8 = sadd.f32 %s166_s7, %s165_s6 }
 0x1e2   :  { %v152_v54 = vsub.f32 %v151_v53, %v145_v50  ;;  %v149_v55 = vmax.f32 %v148_v52, 0.0  ;;  %s168_s9 = smul.f32 0.0, %s167_s8 }
 0x1e4   :  { %v153_v56 = vmax.f32 %v152_v54, 0.0 }
 0x1e6   :  { %v154_v57 = vadd.f32 %v153_v56, %v149_v55 }
 0x1e8   :  { %v155_v58 = vsel %vm96_vm1, %v154_v57, 0.0 }
 0x1e9   :  { %156 = vadd.xlane.f32.xlu0 %v155_v58 }
 0x276   :  { %v157_v59 = vpop.xlane.xlu0 %156 }
 0x277   :  { %v158_v60 = vrot.slane %v157_v59, 4 }
 0x279   :  { %v159_v61 = vadd.f32 %v158_v60, %v157_v59 }
 0x27b   :  { %v160_v62 = vrot.slane %v159_v61, 2 }
 0x27d   :  { %v161_v63 = vadd.f32 %v160_v62, %v159_v61 }
 0x27f   :  { %v162_v0 = vrot.slane %v161_v63, 1 }
 0x281   :  { %v163_v1 = vadd.f32 %v162_v0, %v161_v63 }
 0x283   :  { %196 = vpush %v163_v1 }
 0x2b4   :  { %s197_s10 = spop %196 }
 0x2b5   :  { %s169_s1 = ssub.f32 %s197_s10, %s168_s9 }
 0x2b7   :  { %s170_s11 = smul.f32 0.125, %s169_s1 }
 0x2b9   :  { %172 = sst [smem:[#allocation13]] %s170_s11 }
 0x2ba   :  { %279 = shalt.err (!%p276_p12)
}
 0x2bb   :  { %s291_s20 = smov [#allocation13]  }
 0x2bc   :  { %180 = dma.smem_to_hbm %s291_s20, 16, %s382_s4, [#allocation9]  }
 0x2bd   :  { %284 = dma.done.wait [#allocation9], 16  }
 0x2be   :  { %285 = vsyncadd [#allocation9], 4294967280 }
 0x2bf   :  { %184 = sfence }
 0x2c0   :  { %185 = vsyncpa [#allocation8], 1 }
 0x2c1   :  { %186 = vsyncpa [#allocation11], 1 }
 0x2c2   :  { %187 = vsyncpa [#allocation9], 1 }

</bundles_post_ra>
